<compile_context>
chip_gen: v5e
topology: v5e:2x2
jax: 0.10.0
libtpu: 0.0.40
codegen_flags: <defaults>
</compile_context>

<pallas_src>
import jax
import jax.numpy as jnp
from jax.experimental import pallas as pl
from jax.experimental.pallas import tpu as pltpu


def _gelu(x):
    # Exact-erf GELU (PyTorch nn.GELU default) via Abramowitz & Stegun 7.1.26.
    # The 1/(1+p*a) term uses the EUP approximate reciprocal (idle slot); the added error stays
    # far below the bf16 precision used downstream.
    z = x * 0.7071067811865476
    a = jnp.abs(z)
    t = pl.reciprocal(1.0 + 0.3275911 * a, approx=True)
    poly = t * (0.254829592 + t * (-0.284496736 +
             t * (1.421413741 + t * (-1.453152027 + t * 1.061405429))))
    erf_a = 1.0 - poly * jnp.exp(-a * a)
    erf_z = jnp.where(z < 0.0, -erf_a, erf_a)
    return 0.5 * x * (1.0 + erf_z)


# ---------------------------------------------------------------------------
# Kernel A: pixelwise (proj_1 + GELU, DCNv3 input_proj) — fully tiled
# ---------------------------------------------------------------------------
def make_pixel_kernel():
    def kernel(x_ref, w1_ref, b1_ref, w_in_ref, b_in_ref, u_ref, xproj_ref):
        f32, bf16 = jnp.float32, jnp.bfloat16
        x = x_ref[...].astype(f32)                                  # (PTILE, C)
        u = _gelu(jnp.dot(x.astype(bf16), w1_ref[...],
                          preferred_element_type=f32) + b1_ref[...])
        u_bf = u.astype(bf16)
        u_ref[...] = u_bf
        xp = jnp.dot(u_bf, w_in_ref[...],
                     preferred_element_type=f32) + b_in_ref[...]
        xproj_ref[...] = xp.astype(bf16)
    return kernel


# ---------------------------------------------------------------------------
# Kernel B: row-banded depthwise ks x ks conv + LN + GELU (offset/mask branch input)
# ---------------------------------------------------------------------------
def make_dwconv_kernel(H, W, C, ks, dil, ln_eps, ROWS):
    pad = (dil * (ks - 1)) // 2
    NB = H // ROWS

    def shift_cols(a, s):
        # out[:, w, :] = a[:, w + s, :], zero outside [0, W)   (XLU roll + border mask)
        if s == 0:
            return a
        rolled = pltpu.roll(a, (-s) % W, axis=1)
        wi = jax.lax.broadcasted_iota(jnp.int32, (1, W, 1), 1)
        valid = (wi < (W - s)) if s > 0 else (wi >= (-s))
        return jnp.where(valid, rolled, 0.0)

    def kernel(u_hbm, w_dw_ref, b_dw_ref, ln_g_ref, ln_b_ref, x1_ref, slab, sem):
        f32, bf16 = jnp.float32, jnp.bfloat16
        n = pl.program_id(0)
        b = pl.program_id(1)
        r0 = b * ROWS

        # ---- manual halo DMA: band rows + `pad` halo rows above/below (zeros at image border) ----
        mid = pltpu.make_async_copy(u_hbm.at[n, pl.ds(r0, ROWS)],
                                    slab.at[pad:pad + ROWS], sem.at[0])
        mid.start()

        @pl.when(b > 0)
        def _():
            cp = pltpu.make_async_copy(u_hbm.at[n, pl.ds(r0 - pad, pad)],
                                       slab.at[0:pad], sem.at[1])
            cp.start()
            cp.wait()

        @pl.when(b == 0)
        def _():
            slab[0:pad, :, :] = jnp.zeros((pad, W, C), bf16)

        @pl.when(b < NB - 1)
        def _():
            cp = pltpu.make_async_copy(u_hbm.at[n, pl.ds(r0 + ROWS, pad)],
                                       slab.at[pad + ROWS:2 * pad + ROWS], sem.at[2])
            cp.start()
            cp.wait()

        @pl.when(b == NB - 1)
        def _():
            slab[pad + ROWS:2 * pad + ROWS, :, :] = jnp.zeros((pad, W, C), bf16)

        mid.wait()

        # ---- depthwise conv: row taps = leading-axis slices of the halo slab (aligned),
        #      column taps = one roll + mask per column offset (3 instead of 9 selects) ----
        w_dw = w_dw_ref[...]                                        # (ks*ks, C) f32
        acc = jnp.zeros((ROWS, W, C), f32)
        for dw_ in range(ks):
            s = dw_ * dil - pad
            part = jnp.zeros((ROWS, W, C), f32)
            for dh in range(ks):
                win = slab[dh * dil:dh * dil + ROWS, :, :].astype(f32)
                part = part + win * w_dw[dh * ks + dw_][None, None, :]
            acc = acc + shift_cols(part, s)
        x1 = acc + b_dw_ref[...]

        # ---- LayerNorm(C) + GELU ----
        mu = jnp.mean(x1, axis=-1, keepdims=True)
        var = jnp.mean(jnp.square(x1 - mu), axis=-1, keepdims=True)
        x1 = (x1 - mu) * jax.lax.rsqrt(var + ln_eps)
        x1 = x1 * ln_g_ref[...] + ln_b_ref[...]
        x1_ref[...] = _gelu(x1).astype(bf16)

    return kernel


# ---------------------------------------------------------------------------
# Kernel C: deformable sampling + output_proj + DCA gate + proj_2 + residual
# ---------------------------------------------------------------------------
def make_sampling_kernel(H, W, C, G, ks, stride, TILE, KEY_CHUNK, wdtype):
    HW = H * W
    K = ks * ks
    GK = G * K
    gc = C // G
    n_chunks = HW // KEY_CHUNK

    def kernel(x_ref, x1_ref, xproj_ref, jc_ref,
               w1_ref, b1_ref, w_om_ref, b_om_ref,
               w_out_ref, b_out_ref, w2_ref, b2_ref, o_ref):
        f32, bf16 = jnp.float32, jnp.bfloat16
        t = pl.program_id(1)

        x_t = x_ref[...].astype(f32)                                # (TILE, C)  shortcut rows
        x1_t = x1_ref[...]                                          # (TILE, C)  bf16

        # DCA gate: u = GELU(proj_1(x)), recomputed (cheaper than an HBM round trip)
        u_t = _gelu(jnp.dot(x_t.astype(bf16), w1_ref[...],
                            preferred_element_type=f32) + b1_ref[...])

        # fused offset/mask head (dilation grid + offset_scale pre-folded into w_om/b_om host-side)
        om = jnp.dot(x1_t, w_om_ref[...], preferred_element_type=f32) + b_om_ref[...]
        off_x = om[:, 0:GK]                                         # column order g*K + k
        off_y = om[:, GK:2 * GK]
        msk = om[:, 2 * GK:3 * GK]

        # query-pixel coordinates for this tile (unpadded image frame)
        q = jax.lax.broadcasted_iota(jnp.int32, (TILE, 1), 0) + t * TILE
        base_x = (q % W).astype(f32) * float(stride)
        base_y = (q // W).astype(f32) * float(stride)

        zero_w = jnp.zeros((), wdtype)
        attn = jnp.zeros((TILE, C), f32)

        # TODO(synk): G x K tap loops stay statically unrolled (dynamic lane slicing inside
        # lax.fori_loop is not guaranteed to lower on Mosaic); fine for G*K <= ~32.
        for g in range(G):
            # softmax over the K taps of this group (EUP reciprocal, not a VALU divide)
            m_g = msk[:, g * K:(g + 1) * K]
            m_g = m_g - jnp.max(m_g, axis=-1, keepdims=True)
            e_g = jnp.exp(m_g)
            p_g = e_g * pl.reciprocal(jnp.sum(e_g, axis=-1, keepdims=True), approx=True)

            # all-tap sampling coordinates (grid_sample align_corners=False in unpadded coords;
            # the F.pad shift and the -0.5 pixel-centre shift cancel exactly)
            px = base_x + off_x[:, g * K:(g + 1) * K]
            py = base_y + off_y[:, g * K:(g + 1) * K]
            x0 = jnp.floor(px)
            y0 = jnp.floor(py)
            fx = px - x0
            fy = py - y0
            x0i = x0.astype(jnp.int32)
            y0i = y0.astype(jnp.int32)

            # per-tap (TILE,1) corner invariants, softmax weight folded into the x corners,
            # cast once to the VPU weight dtype (bf16 on v6e/v7x, f32 on v5e)
            taps = []
            for k in range(K):
                pk = p_g[:, k:k + 1]
                fxk = fx[:, k:k + 1]
                fyk = fy[:, k:k + 1]
                taps.append((x0i[:, k:k + 1], y0i[:, k:k + 1],
                             ((1.0 - fxk) * pk).astype(wdtype), (fxk * pk).astype(wdtype),
                             (1.0 - fyk).astype(wdtype), fyk.astype(wdtype)))

            # mask-folded dense bilinear weights built KEY_CHUNK key columns at a time; each chunk
            # is contracted on the MXU immediately (bounds the (TILE, HW) live set and spills).
            # Out-of-range corners match no column => grid_sample padding_mode='zeros' for free.
            samp = jnp.zeros((TILE, gc), f32)
            for c in range(n_chunks):
                c0 = c * KEY_CHUNK
                j_wi = jc_ref[0:1, c0:c0 + KEY_CHUNK]               # (1, KEY_CHUNK) int32
                j_hi = jc_ref[1:2, c0:c0 + KEY_CHUNK]
                wsum = jnp.zeros((TILE, KEY_CHUNK), wdtype)
                for (x0k, y0k, wxl, wxr, wyl, wyr) in taps:
                    wx = (jnp.where(j_wi == x0k, wxl, zero_w) +
                          jnp.where(j_wi == x0k + 1, wxr, zero_w))
                    wy = (jnp.where(j_hi == y0k, wyl, zero_w) +
                          jnp.where(j_hi == y0k + 1, wyr, zero_w))
                    wsum = wsum + wx * wy
                samp = samp + jnp.dot(
                    wsum.astype(bf16),
                    xproj_ref[c0:c0 + KEY_CHUNK, g * gc:(g + 1) * gc],
                    preferred_element_type=f32)

            # output_proj accumulated per group -> lane-dense (TILE, C); no 16-lane scratch stores
            attn = attn + jnp.dot(samp.astype(bf16), w_out_ref[g * gc:(g + 1) * gc, :],
                                  preferred_element_type=f32)

        attn = attn + b_out_ref[...]
        z = u_t * attn                                              # DCA: u * attn
        out = jnp.dot(z.astype(bf16), w2_ref[...],
                      preferred_element_type=f32) + b2_ref[...] + x_t
        o_ref[...] = out.astype(o_ref.dtype)

    return kernel


# ---------------------------------------------------------------------------
# Wrapper
# ---------------------------------------------------------------------------
def _tpu_flavor():
    try:
        kind = jax.devices()[0].device_kind.lower()
    except Exception:
        return "unknown"
    for tag in ("v5", "v6", "v7"):
        if tag in kind:
            return tag
    return "unknown"


def _pick_tile(hw, max_tile):
    if hw <= max_tile:
        return hw
    for step in (16, 8):
        start = (max_tile // step) * step
        for t in range(start, step - 1, -step):
            if hw % t == 0:
                return t
    return hw


def _pick_key_chunk(hw, max_chunk):
    if hw <= max_chunk:
        return hw
    best = None
    for c in range(max_chunk, 0, -1):
        if hw % c == 0:
            if c % 128 == 0:
                return c
            if best is None:
                best = c
    return best or hw


def _pick_rows(H, W, C, budget_bytes=2 * 1024 * 1024):
    t = max(1, min(H, budget_bytes // max(1, W * C * 4)))
    for r in range(t, 0, -1):
        if H % r == 0:
            return r
    return 1


def _rep_spec(arr):
    nd = arr.ndim
    return pl.BlockSpec(arr.shape, lambda n, t, _n=nd: (0,) * _n)


def attention_pallas(x_nchw, params, *, ks=3, dil=1, stride=1, offset_scale=1.0,
                     ln_eps=1e-6):
    N, C, H, W = x_nchw.shape
    assert C % 16 == 0 and C >= 16
    HW = H * W
    G = C // 16                       # DCNv3 group = channels // 16 (group_channels = 16)
    K = ks * ks
    pad = (dil * (ks - 1)) // 2
    center = pad
    f32, bf16 = jnp.float32, jnp.bfloat16

    # --- per-generation tuning (bf16 VPU weights + VMEM budget) ---
    flavor = _tpu_flavor()
    if flavor == "v5":      # 128 MiB VMEM, no bf16 VALU, 4x128^2 MXUs
        wdtype, max_tile, vmem_limit, key_chunk_max = f32, 128, 96 * 1024 * 1024, 512
    elif flavor == "v6":    # 128 MiB VMEM, bf16 VALU
        wdtype, max_tile, vmem_limit, key_chunk_max = bf16, 256, 96 * 1024 * 1024, 1024
    elif flavor == "v7":    # 64 MiB VMEM, bf16 VALU
        wdtype, max_tile, vmem_limit, key_chunk_max = bf16, 256, 48 * 1024 * 1024, 1024
    else:
        wdtype, max_tile, vmem_limit, key_chunk_max = f32, 256, 48 * 1024 * 1024, 512

    TILE = _pick_tile(HW, max_tile)
    T = HW // TILE
    PTILE = _pick_tile(HW, 512)
    TP = HW // PTILE
    KEY_CHUNK = _pick_key_chunk(HW, key_chunk_max)
    ROWS = _pick_rows(H, W, C)
    NB = H // ROWS

    # NCHW -> (N, HW, C) channels-last (DCNv3 layout); 1x1 convs are per-pixel Linears.
    x_flat = jnp.transpose(x_nchw, (0, 2, 3, 1)).reshape(N, HW, C)

    # matmul weights as bf16 (MXU operands); biases / LN / depthwise taps stay f32.
    w1 = params["w1"].astype(bf16);    b1 = params["b1"].astype(f32)
    w2 = params["w2"].astype(bf16);    b2 = params["b2"].astype(f32)
    w_in = params["w_in"].astype(bf16);   b_in = params["b_in"].astype(f32)
    w_dw = params["w_dw"].astype(f32);    b_dw = params["b_dw"].astype(f32)
    ln_g = params["ln_g"].astype(f32);    ln_b = params["ln_b"].astype(f32)
    w_out = params["w_out"].astype(bf16); b_out = params["b_out"].astype(f32)

    # fused offset+mask head: de-interleave (x, y) columns (contiguous K-wide blocks per group),
    # fold the dilation-grid tap displacements and offset_scale into the head weights/bias.
    w_off, b_off = params["w_off"], params["b_off"]   # (C, 2*G*K) / (1, 2*G*K), (x,y) interleaved
    w_msk, b_msk = params["w_msk"], params["b_msk"]   # (C, G*K)   / (1, G*K)
    dg_x = jnp.array([(ix * dil - center) for ix in range(ks) for jy in range(ks)], f32)
    dg_y = jnp.array([(jy * dil - center) for ix in range(ks) for jy in range(ks)], f32)
    dg_x = jnp.tile(dg_x, (G,))[None, :]              # (1, GK), column order g*K + k
    dg_y = jnp.tile(dg_y, (G,))[None, :]
    w_om = jnp.concatenate([w_off[:, 0::2] * offset_scale,
                            w_off[:, 1::2] * offset_scale,
                            w_msk], axis=1).astype(bf16)
    b_om = jnp.concatenate([(b_off[:, 0::2] + dg_x) * offset_scale,
                            (b_off[:, 1::2] + dg_y) * offset_scale,
                            b_msk], axis=1).astype(f32)

    # key-pixel (wi, hi) coordinates, precomputed (no in-kernel div/mod over HW)
    jj = jnp.arange(HW, dtype=jnp.int32)
    jcoord = jnp.stack([jj % W, jj // W], axis=0)     # (2, HW) int32

    cparams = pltpu.CompilerParams(dimension_semantics=("parallel", "parallel"),
                                   vmem_limit_bytes=vmem_limit)

    # ---------------- call A: pixelwise proj_1 + input_proj ----------------
    pre_w = (w1, b1, w_in, b_in)
    u_bf, xproj_bf = pl.pallas_call(
        make_pixel_kernel(),
        out_shape=(jax.ShapeDtypeStruct((N, HW, C), bf16),
                   jax.ShapeDtypeStruct((N, HW, C), bf16)),
        grid_spec=pltpu.PrefetchScalarGridSpec(
            num_scalar_prefetch=0,
            grid=(N, TP),
            in_specs=[pl.BlockSpec((None, PTILE, C), lambda n, t: (n, t, 0))]
                     + [_rep_spec(w) for w in pre_w],
            out_specs=[pl.BlockSpec((None, PTILE, C), lambda n, t: (n, t, 0)),
                       pl.BlockSpec((None, PTILE, C), lambda n, t: (n, t, 0))]),
        compiler_params=cparams,
    )(x_flat, *pre_w)

    # ---------------- call B: row-banded depthwise conv + LN + GELU ----------------
    u_img = u_bf.reshape(N, H, W, C)
    x1_img = pl.pallas_call(
        make_dwconv_kernel(H, W, C, ks, dil, ln_eps, ROWS),
        out_shape=jax.ShapeDtypeStruct((N, H, W, C), bf16),
        grid_spec=pltpu.PrefetchScalarGridSpec(
            num_scalar_prefetch=0,
            grid=(N, NB),
            in_specs=[pl.BlockSpec(memory_space=pl.ANY),       # u stays in HBM, halo DMA'd manually
                      _rep_spec(w_dw), _rep_spec(b_dw),
                      _rep_spec(ln_g), _rep_spec(ln_b)],
            out_specs=pl.BlockSpec((None, ROWS, W, C), lambda n, b: (n, b, 0, 0)),
            scratch_shapes=[pltpu.VMEM((ROWS + 2 * pad, W, C), bf16),
                            pltpu.SemaphoreType.DMA((3,))]),
        compiler_params=cparams,
    )(u_img, w_dw, b_dw, ln_g, ln_b)
    x1_bf = x1_img.reshape(N, HW, C)

    # ---------------- call C: sampling + output_proj + gate + proj_2 + residual ----------------
    samp_w = (w1, b1, w_om, b_om, w_out, b_out, w2, b2)
    out_flat = pl.pallas_call(
        make_sampling_kernel(H, W, C, G, ks, stride, TILE, KEY_CHUNK, wdtype),
        out_shape=jax.ShapeDtypeStruct((N, HW, C), x_nchw.dtype),
        grid_spec=pltpu.PrefetchScalarGridSpec(
            num_scalar_prefetch=0,
            grid=(N, T),
            in_specs=[pl.BlockSpec((None, TILE, C), lambda n, t: (n, t, 0)),   # x tile (shortcut/gate)
                      pl.BlockSpec((None, TILE, C), lambda n, t: (n, t, 0)),   # x1 tile
                      pl.BlockSpec((None, HW, C),   lambda n, t: (n, 0, 0)),   # projected image
                      _rep_spec(jcoord)]
                     + [_rep_spec(w) for w in samp_w],
            out_specs=pl.BlockSpec((None, TILE, C), lambda n, t: (n, t, 0))),
        compiler_params=cparams,
    )(x_flat, x1_bf, xproj_bf, jcoord, *samp_w)

    return jnp.transpose(out_flat.reshape(N, H, W, C), (0, 3, 1, 2))


if __name__ == "__main__":
    # small shapes: N=2, d_model=32, H=W=8  ->  DCNv3 group = 2, group_channels = 16, K = 9
    N, C, H, W = 2, 32, 8, 8
    G, K = C // 16, 9

    key = jax.random.PRNGKey(0)
    keys = iter(jax.random.split(key, 24))

    def nrm(shape, scale):
        return jax.random.normal(next(keys), shape, jnp.float32) * scale

    x = jax.random.normal(next(keys), (N, C, H, W), jnp.float32)     # NCHW, like the PyTorch module

    # deterministic synthetic parameters; Linear / 1x1-conv weights stored pre-transposed (in, out),
    # depthwise 3x3 conv weights as (K, C).
    params = dict(
        w1=nrm((C, C), 0.10),            b1=nrm((1, C), 0.01),          # Attention.proj_1
        w2=nrm((C, C), 0.10),            b2=nrm((1, C), 0.01),          # Attention.proj_2
        w_in=nrm((C, C), 0.10),          b_in=nrm((1, C), 0.01),        # DCNv3.input_proj
        w_dw=nrm((K, C), 0.10),          b_dw=nrm((1, C), 0.01),        # DCNv3.dw_conv (depthwise 3x3)
        ln_g=jnp.ones((1, C), jnp.float32) + nrm((1, C), 0.01),
        ln_b=nrm((1, C), 0.01),
        w_off=nrm((C, G * K * 2), 0.02), b_off=nrm((1, G * K * 2), 0.02),
        w_msk=nrm((C, G * K), 0.05),     b_msk=nrm((1, G * K), 0.01),
        w_out=nrm((C, C), 0.10),         b_out=nrm((1, C), 0.01),       # DCNv3.output_proj
    )

    out = attention_pallas(x, params)
    jax.block_until_ready(out)
    assert out.shape == x.shape and out.dtype == x.dtype
    print("KERNEL_OK")
</pallas_src>

<mosaic_0001>
module attributes {stable_mosaic.version = 11 : i64} {
  func.func @kernel(%arg0: i32, %arg1: i32, %arg2: memref<1x64x32xf32, #tpu.memory_space<vmem>>, %arg3: memref<32x32xbf16, #tpu.memory_space<vmem>>, %arg4: memref<1x32xf32, #tpu.memory_space<vmem>>, %arg5: memref<32x32xbf16, #tpu.memory_space<vmem>>, %arg6: memref<1x32xf32, #tpu.memory_space<vmem>>, %arg7: memref<1x64x32xbf16, #tpu.memory_space<vmem>>, %arg8: memref<1x64x32xbf16, #tpu.memory_space<vmem>>) attributes {dimension_semantics = [#tpu.dimension_semantics<parallel>, #tpu.dimension_semantics<parallel>], iteration_bounds = array<i64: 2, 1>, scalar_prefetch = 0 : i64, scratch_operands = 0 : i64, tpu.core_type = #tpu.core_type<tc>, window_params = [{transform_indices = @transform_0, window_bounds = array<i64: 1, 64, 32>}, {pipeline_mode = #tpu.pipeline_mode<synchronous>, transform_indices = @transform_1, window_bounds = array<i64: 32, 32>}, {pipeline_mode = #tpu.pipeline_mode<synchronous>, transform_indices = @transform_2, window_bounds = array<i64: 1, 32>}, {pipeline_mode = #tpu.pipeline_mode<synchronous>, transform_indices = @transform_3, window_bounds = array<i64: 32, 32>}, {pipeline_mode = #tpu.pipeline_mode<synchronous>, transform_indices = @transform_4, window_bounds = array<i64: 1, 32>}, {transform_indices = @transform_5, window_bounds = array<i64: 1, 64, 32>}, {transform_indices = @transform_6, window_bounds = array<i64: 1, 64, 32>}]} {
    %c0 = arith.constant 0 : index
    %c0_0 = arith.constant 0 : index
    %c0_1 = arith.constant 0 : index
    %0 = vector.load %arg2[%c0, %c0_0, %c0_1] : memref<1x64x32xf32, #tpu.memory_space<vmem>>, vector<1x64x32xf32>
    %1 = vector.shape_cast %0 : vector<1x64x32xf32> to vector<64x32xf32>
    %2 = arith.truncf %1 : vector<64x32xf32> to vector<64x32xbf16>
    %c0_2 = arith.constant 0 : index
    %c0_3 = arith.constant 0 : index
    %3 = vector.load %arg3[%c0_2, %c0_3] : memref<32x32xbf16, #tpu.memory_space<vmem>>, vector<32x32xbf16>
    %cst = arith.constant dense<0.000000e+00> : vector<64x32xf32>
    %4 = tpu.matmul %2, %3, %cst {dimension_numbers = #tpu.dot_dimension_numbers<[1], [0], [0], [1], [0, 0, 1, 1], [], []>} : vector<64x32xbf16>, vector<32x32xbf16>, vector<64x32xf32> -> vector<64x32xf32>
    %c0_4 = arith.constant 0 : index
    %c0_5 = arith.constant 0 : index
    %5 = vector.load %arg4[%c0_4, %c0_5] : memref<1x32xf32, #tpu.memory_space<vmem>>, vector<1x32xf32>
    %6 = vector.broadcast %5 : vector<1x32xf32> to vector<64x32xf32>
    %7 = arith.addf %4, %6 : vector<64x32xf32>
    %cst_6 = arith.constant 0.707106769 : f32
    %8 = vector.broadcast %cst_6 : f32 to vector<64x32xf32>
    %9 = arith.mulf %7, %8 : vector<64x32xf32>
    %10 = math.absf %9 : vector<64x32xf32>
    %cst_7 = arith.constant 0.327591091 : f32
    %11 = vector.broadcast %cst_7 : f32 to vector<64x32xf32>
    %12 = arith.mulf %11, %10 : vector<64x32xf32>
    %cst_8 = arith.constant 1.000000e+00 : f32
    %13 = vector.broadcast %cst_8 : f32 to vector<64x32xf32>
    %14 = arith.addf %13, %12 : vector<64x32xf32>
    %15 = tpu.reciprocal %14 {approx = true} : vector<64x32xf32> -> vector<64x32xf32>
    %cst_9 = arith.constant 1.06140542 : f32
    %16 = vector.broadcast %cst_9 : f32 to vector<64x32xf32>
    %17 = arith.mulf %15, %16 : vector<64x32xf32>
    %cst_10 = arith.constant -1.45315206 : f32
    %18 = vector.broadcast %cst_10 : f32 to vector<64x32xf32>
    %19 = arith.addf %18, %17 : vector<64x32xf32>
    %20 = arith.mulf %15, %19 : vector<64x32xf32>
    %cst_11 = arith.constant 1.42141378 : f32
    %21 = vector.broadcast %cst_11 : f32 to vector<64x32xf32>
    %22 = arith.addf %21, %20 : vector<64x32xf32>
    %23 = arith.mulf %15, %22 : vector<64x32xf32>
    %cst_12 = arith.constant -0.284496725 : f32
    %24 = vector.broadcast %cst_12 : f32 to vector<64x32xf32>
    %25 = arith.addf %24, %23 : vector<64x32xf32>
    %26 = arith.mulf %15, %25 : vector<64x32xf32>
    %cst_13 = arith.constant 0.254829586 : f32
    %27 = vector.broadcast %cst_13 : f32 to vector<64x32xf32>
    %28 = arith.addf %27, %26 : vector<64x32xf32>
    %29 = arith.mulf %15, %28 : vector<64x32xf32>
    %cst_14 = arith.constant 0.000000e+00 : f32
    %30 = vector.broadcast %cst_14 : f32 to vector<64x32xf32>
    %31 = arith.subf %30, %10 : vector<64x32xf32>
    %32 = arith.mulf %31, %10 : vector<64x32xf32>
    %33 = math.exp %32 : vector<64x32xf32>
    %34 = arith.mulf %29, %33 : vector<64x32xf32>
    %cst_15 = arith.constant 1.000000e+00 : f32
    %35 = vector.broadcast %cst_15 : f32 to vector<64x32xf32>
    %36 = arith.subf %35, %34 : vector<64x32xf32>
    %cst_16 = arith.constant 0.000000e+00 : f32
    %37 = vector.broadcast %cst_16 : f32 to vector<64x32xf32>
    %38 = arith.cmpf olt, %9, %37 : vector<64x32xf32>
    %cst_17 = arith.constant 0.000000e+00 : f32
    %39 = vector.broadcast %cst_17 : f32 to vector<64x32xf32>
    %40 = arith.subf %39, %36 : vector<64x32xf32>
    %41 = arith.select %38, %40, %36 : vector<64x32xi1>, vector<64x32xf32>
    %cst_18 = arith.constant 5.000000e-01 : f32
    %42 = vector.broadcast %cst_18 : f32 to vector<64x32xf32>
    %43 = arith.mulf %42, %7 : vector<64x32xf32>
    %cst_19 = arith.constant 1.000000e+00 : f32
    %44 = vector.broadcast %cst_19 : f32 to vector<64x32xf32>
    %45 = arith.addf %44, %41 : vector<64x32xf32>
    %46 = arith.mulf %43, %45 : vector<64x32xf32>
    %47 = arith.truncf %46 : vector<64x32xf32> to vector<64x32xbf16>
    %c0_20 = arith.constant 0 : index
    %c0_21 = arith.constant 0 : index
    %c0_22 = arith.constant 0 : index
    %48 = vector.load %arg7[%c0_20, %c0_21, %c0_22] : memref<1x64x32xbf16, #tpu.memory_space<vmem>>, vector<1x64x32xbf16>
    %49 = vector.shape_cast %48 : vector<1x64x32xbf16> to vector<64x32xbf16>
    %50 = vector.shape_cast %47 : vector<64x32xbf16> to vector<1x64x32xbf16>
    tpu.vector_store %arg7[%c0_20, %c0_21, %c0_22], %50 {strides = array<i32>} : memref<1x64x32xbf16, #tpu.memory_space<vmem>>, vector<1x64x32xbf16>,
    %c0_23 = arith.constant 0 : index
    %c0_24 = arith.constant 0 : index
    %51 = vector.load %arg5[%c0_23, %c0_24] : memref<32x32xbf16, #tpu.memory_space<vmem>>, vector<32x32xbf16>
    %cst_25 = arith.constant dense<0.000000e+00> : vector<64x32xf32>
    %52 = tpu.matmul %47, %51, %cst_25 {dimension_numbers = #tpu.dot_dimension_numbers<[1], [0], [0], [1], [0, 0, 1, 1], [], []>} : vector<64x32xbf16>, vector<32x32xbf16>, vector<64x32xf32> -> vector<64x32xf32>
    %c0_26 = arith.constant 0 : index
    %c0_27 = arith.constant 0 : index
    %53 = vector.load %arg6[%c0_26, %c0_27] : memref<1x32xf32, #tpu.memory_space<vmem>>, vector<1x32xf32>
    %54 = vector.broadcast %53 : vector<1x32xf32> to vector<64x32xf32>
    %55 = arith.addf %52, %54 : vector<64x32xf32>
    %56 = arith.truncf %55 : vector<64x32xf32> to vector<64x32xbf16>
    %c0_28 = arith.constant 0 : index
    %c0_29 = arith.constant 0 : index
    %c0_30 = arith.constant 0 : index
    %57 = vector.load %arg8[%c0_28, %c0_29, %c0_30] : memref<1x64x32xbf16, #tpu.memory_space<vmem>>, vector<1x64x32xbf16>
    %58 = vector.shape_cast %57 : vector<1x64x32xbf16> to vector<64x32xbf16>
    %59 = vector.shape_cast %56 : vector<64x32xbf16> to vector<1x64x32xbf16>
    tpu.vector_store %arg8[%c0_28, %c0_29, %c0_30], %59 {strides = array<i32>} : memref<1x64x32xbf16, #tpu.memory_space<vmem>>, vector<1x64x32xbf16>,
    return
  }
  func.func @transform_0(%arg0: i32, %arg1: i32) -> (i32, i32, i32) {
    %c0_i32 = arith.constant 0 : i32
    %c0_i32_0 = arith.constant 0 : i32
    return %arg0, %arg1, %c0_i32 : i32, i32, i32
  }
  func.func @transform_1(%arg0: i32, %arg1: i32) -> (i32, i32) {
    %c0_i32 = arith.constant 0 : i32
    %c0_i32_0 = arith.constant 0 : i32
    %c0_i32_1 = arith.constant 0 : i32
    return %c0_i32, %c0_i32_0 : i32, i32
  }
  func.func @transform_2(%arg0: i32, %arg1: i32) -> (i32, i32) {
    %c0_i32 = arith.constant 0 : i32
    %c0_i32_0 = arith.constant 0 : i32
    %c0_i32_1 = arith.constant 0 : i32
    return %c0_i32, %c0_i32_0 : i32, i32
  }
  func.func @transform_3(%arg0: i32, %arg1: i32) -> (i32, i32) {
    %c0_i32 = arith.constant 0 : i32
    %c0_i32_0 = arith.constant 0 : i32
    %c0_i32_1 = arith.constant 0 : i32
    return %c0_i32, %c0_i32_0 : i32, i32
  }
  func.func @transform_4(%arg0: i32, %arg1: i32) -> (i32, i32) {
    %c0_i32 = arith.constant 0 : i32
    %c0_i32_0 = arith.constant 0 : i32
    %c0_i32_1 = arith.constant 0 : i32
    return %c0_i32, %c0_i32_0 : i32, i32
  }
  func.func @transform_5(%arg0: i32, %arg1: i32) -> (i32, i32, i32) {
    %c0_i32 = arith.constant 0 : i32
    %c0_i32_0 = arith.constant 0 : i32
    return %arg0, %arg1, %c0_i32 : i32, i32, i32
  }
  func.func @transform_6(%arg0: i32, %arg1: i32) -> (i32, i32, i32) {
    %c0_i32 = arith.constant 0 : i32
    %c0_i32_0 = arith.constant 0 : i32
    return %arg0, %arg1, %c0_i32 : i32, i32, i32
  }
}

</mosaic_0001>

<bundles_post_ra>
// kernel: tpu_custom_call.1
= control target key start
LH: loop header
LB: loop body
LE: loop exit
PB: predicated region body
PF: predicated region fallthrough
CT: control target
= control target key end

     0   :  { %s1014_s21 = smov 0   ;;  %s1016_s22 = smov 0   ;;  %s1240_s0 = inlined_call_operand.vmem [shape: f32[2,64,32], index: 0, kind: input, shape index: {}]   ;;  %s1241_s1 = inlined_call_operand.vmem [shape: bf16[32,32], index: 1, kind: input, shape index: {}]   ;;  %s1242_s2 = inlined_call_operand.vmem [shape: f32[1,32], index: 2, kind: input, shape index: {}]   ;;  %s1243_s3 = inlined_call_operand.vmem [shape: bf16[32,32], index: 3, kind: input, shape index: {}]   ;;  %s1244_s4 = inlined_call_operand.vmem [shape: f32[1,32], index: 4, kind: input, shape index: {}]   ;;  %s1245_s5 = inlined_call_operand.vmem [shape: bf16[2,64,32], index: 5, kind: output, shape index: {0}]   ;;  %s1246_s6 = inlined_call_operand.vmem [shape: bf16[2,64,32], index: 6, kind: output, shape index: {1}]  }
   0x1   :  { %s1018_s23 = smov 0  }
   0x2 LB: > { %s29_s24 = sadd.s32 1, %s973_s22  ;;  %p853_p0 = scmp.ge.s32.totalorder %s977_s23, 1  ;;  %s977_s23 = sphi %s1018_s23, %s17_s23   ;;  %s973_s22 = sphi %s1016_s22, %s1248_s22   ;;  %s969_s21 = sphi %s1014_s21, %s1247_s21  }
   0x3   : > { %p31_p1 = scmp.ge.s32.totalorder %s29_s24, 2  ;;  %p238_p2 = scmp.lt.s32.totalorder %s977_s23, 3 }
   0x5   : > { %s1250_s24 = smov (%p31_p1, %s29_s24), 0  ;;  %p239_p3 = pnand %p853_p0, %p238_p2 }
   0x6   : > { %p286_p4 = scmp.lt.s32.totalorder (!%p239_p3), %s969_s21, 1 }
   0x7   : > { %242 = sbr.rel (%p239_p3) target bundleno = 382 (0x17e), region = 40 }
   0xc   : > { %v890_v0 = vld [vmem:[%s1241_s1 + $0x8] sm:$0xff]  ;;  %v889_v1 = vld [vmem:[%s1241_s1] sm:$0xff]  ;;  %s1252_s21 = smov (!%p286_p4, %s969_s21), 1  ;;  %vm348_vm0 = vcmask 261120   ;;  %vm606_vm2 = vcmask 257024  }
   0xd   : > { %367 = vmatpush.bf16.msra.mxu0 %v890_v0  ;;  %893 = vmatpush.bf16.msra.mxu2 %v890_v0  ;;  %s886_s29 = sshll.u32 %s1252_s21, 6  ;;  %v1051_v14 = vld [vmem:[%s1242_s2] ss:$0 sm:$0xff]  ;;  %s887_s15 = sshll.u32 %s1252_s21, 5 }
   0xe   : > { %s293_s8 = scalar_lea.vmem %s1240_s0, %s886_s29  ;;  %s1163_s18 = scalar_lea.vmem %s1245_s5, %s887_s15 }
   0xf   : > { %v316_v2 = vld [vmem:[%s293_s8] sm:$0xff]  ;;  %v317_v3 = vld [vmem:[%s293_s8 + $0x8] sm:$0xff]  ;;  %v318_v8 = vld [vmem:[%s293_s8 + $0x10] sm:$0xff]  ;;  %s313_s27 = scalar_lea.vmem %s1246_s6, %s887_s15 }
  0x10   : > { %v320_v4 = vld [vmem:[%s293_s8 + $0x20] sm:$0xff]  ;;  %v324_v5 = vpack.c.bf16 %v317_v3, %v316_v2  ;;  %v321_v6 = vld [vmem:[%s293_s8 + $0x28] sm:$0xff]  ;;  %v319_v9 = vld [vmem:[%s293_s8 + $0x18] sm:$0xff] }
  0x11   : > { %368 = vmatpush.bf16.msra.mxu0 %v889_v1  ;;  %894 = vmatpush.bf16.msra.mxu2 %v889_v1  ;;  %v326_v7 = vpack.c.bf16 %v321_v6, %v320_v4  ;;  %v322_v10 = vld [vmem:[%s293_s8 + $0x30] sm:$0xff]  ;;  %v323_v11 = vld [vmem:[%s293_s8 + $0x38] sm:$0xff]  ;;  %v325_v12 = vpack.c.bf16 %v319_v9, %v318_v8 }
  0x12   : > { %v327_v13 = vpack.c.bf16 %v323_v11, %v322_v10 }
  0x14   : > { %868 = vmatmul.msk.bf16.vlgmr.msra.gmra.mxu0 %vm348_vm0, %v324_v5  ;;  %870 = vmatmul.msk.bf16.vlgmr.msra.gmra.mxu2 %vm348_vm0, %v326_v7 }
  0x24   : > { %869 = vmatmul.msk.bf16.gmra.mxu0 %vm348_vm0, %v325_v12  ;;  %871 = vmatmul.msk.bf16.gmra.mxu2 %vm348_vm0, %v327_v13 }
  0x91   : > { %v370_v15 = vpop.f32.mrf.mxu0 }
  0x92   : > { %v371_v16 = vadd.f32 %v1051_v14, %v370_v15 }
  0x94   : > { %v1054_v17 = vmul.f32 0.70710677, %v371_v16  ;;  %v1080_v50 = vmul.f32 0.5, %v371_v16 }
  0x96   : > { %v398_v18 = vand.u32 2147483647, %v1054_v17  ;;  %vm550_vm1 = vcmp.lt.f32.partialorder %v1054_v17, 0.0 }
  0x97   : > { %v380_v20 = vpop.f32.mrf.mxu2 }
  0x98   : > { %v406_v19 = vmul.f32 0.3275911, %v398_v18  ;;  %v381_v21 = vadd.f32 %v1051_v14, %v380_v20  ;;  %v502_v30 = vsub.f32 0.0, %v398_v18 }
  0x99   : > { %v372_v22 = vpop.f32.mrf.mxu0 }
  0x9a   : > { %v414_v23 = vadd.f32 1.0, %v406_v19  ;;  %v373_v24 = vadd.f32 %v1051_v14, %v372_v22  ;;  %v1059_v25 = vmul.f32 0.70710677, %v381_v21  ;;  %v510_v42 = vmul.f32 %v502_v30, %v398_v18 }
  0x9b   : > { %v1082_v53 = vmul.f32 0.5, %v381_v21 }
  0x9c   : > { %923 = vrcp.f32 %v414_v23  ;;  %v1061_v26 = vmul.f32 0.70710677, %v373_v24  ;;  %v402_v27 = vand.u32 2147483647, %v1059_v25  ;;  %v518_v52 = vmul.f32 1.442695, %v510_v42 }
  0x9d   : > { %v1084_v54 = vmul.f32 0.5, %v373_v24  ;;  %vm554_vm3 = vcmp.lt.f32.partialorder %v1059_v25, 0.0 }
  0x9e   : > { %v399_v28 = vand.u32 2147483647, %v1061_v26  ;;  %v410_v29 = vmul.f32 0.3275911, %v402_v27  ;;  %v506_v37 = vsub.f32 0.0, %v402_v27  ;;  %vm551_vm4 = vcmp.lt.f32.partialorder %v1061_v26, 0.0 }
  0x9f   : > { %v382_v32 = vpop.f32.mrf.mxu2 }
  0xa0   : > { %v407_v31 = vmul.f32 0.3275911, %v399_v28  ;;  %v418_v33 = vadd.f32 1.0, %v410_v29  ;;  %v383_v34 = vadd.f32 %v1051_v14, %v382_v32  ;;  %v503_v45 = vsub.f32 0.0, %v399_v28 }
  0xa1   : > { %v375_v35 = vpop.f32.mrf.mxu0  ;;  %v514_v47 = vmul.f32 %v506_v37, %v402_v27 }
  0xa2   : > { %v1066_v36 = vpop.eup %923  ;;  %v415_v38 = vadd.f32 1.0, %v407_v31  ;;  %v1069_v39 = vadd.f32 %v1051_v14, %v375_v35  ;;  %925 = vrcp.f32 %v418_v33  ;;  %v1072_v41 = vmul.f32 0.70710677, %v383_v34 }
  0xa3   : > { %v430_v40 = vmul.f32 1.0614054, %v1066_v36  ;;  %v511_v59 = vmul.f32 %v503_v45, %v399_v28  ;;  %v526_v1 = vmul.f32 1.442695, %v514_v47  ;;  %v1106_v20 = vmul.f32 0.5, %v383_v34 }
  0xa4   : > { %927 = vrcp.f32 %v415_v38  ;;  %v1075_v43 = vmul.f32 0.70710677, %v1069_v39  ;;  %v403_v46 = vand.u32 2147483647, %v1072_v41  ;;  %vm555_vm5 = vcmp.lt.f32.partialorder %v1072_v41, 0.0 }
  0xa5   : > { %v438_v44 = vadd.f32 -1.4531521, %v430_v40  ;;  %v520_v12 = vmul.f32 1.442695, %v511_v59 }
  0xa6   : > { %v400_v48 = vand.u32 2147483647, %v1075_v43  ;;  %v411_v51 = vmul.f32 0.3275911, %v403_v46  ;;  %v507_v2 = vsub.f32 0.0, %v403_v46  ;;  %vm552_vm6 = vcmp.lt.f32.partialorder %v1075_v43, 0.0 }
  0xa7   : > { %v446_v49 = vmul.f32 %v1066_v36, %v438_v44  ;;  %v385_v56 = vpop.f32.mrf.mxu2 }
  0xa8   : > { %v408_v55 = vmul.f32 0.3275911, %v400_v48  ;;  %v1086_v57 = vpop.eup %925  ;;  %v419_v60 = vadd.f32 1.0, %v411_v51  ;;  %v1089_v61 = vadd.f32 %v1051_v14, %v385_v56  ;;  %v504_v8 = vsub.f32 0.0, %v400_v48 }
  0xa9   : > { %v454_v58 = vadd.f32 1.4214138, %v446_v49  ;;  %v377_v62 = vpop.f32.mrf.mxu0  ;;  %v434_v0 = vmul.f32 1.0614054, %v1086_v57  ;;  %v515_v15 = vmul.f32 %v507_v2, %v403_v46 }
  0xaa   : > { %v1091_v63 = vpop.eup %927  ;;  %v416_v3 = vadd.f32 1.0, %v408_v55  ;;  %929 = vrcp.f32 %v419_v60  ;;  %v1097_v6 = vadd.f32 %v1051_v14, %v377_v62  ;;  %v1100_v9 = vmul.f32 0.70710677, %v1089_v61 }
  0xab   : > { %v462_v4 = vmul.f32 %v1066_v36, %v454_v58  ;;  %v431_v5 = vmul.f32 1.0614054, %v1091_v63  ;;  %v442_v7 = vadd.f32 -1.4531521, %v434_v0  ;;  %v512_v23 = vmul.f32 %v504_v8, %v400_v48 }
  0xac   : > { %931 = vrcp.f32 %v416_v3  ;;  %v404_v16 = vand.u32 2147483647, %v1100_v9  ;;  %v1109_v21 = vmul.f32 0.70710677, %v1097_v6  ;;  %v528_v34 = vmul.f32 1.442695, %v515_v15 }
  0xad   : > { %v470_v10 = vadd.f32 -0.28449672, %v462_v4  ;;  %v439_v11 = vadd.f32 -1.4531521, %v431_v5  ;;  %933 = vpow2.f32 %v518_v52  ;;  %v450_v13 = vmul.f32 %v1086_v57, %v442_v7  ;;  %v892_v3 = vld [vmem:[%s1243_s3 + $0x8] sm:$0xff] }
  0xae   : > { %935 = vpow2.f32 %v526_v1  ;;  %v412_v24 = vmul.f32 0.3275911, %v404_v16  ;;  %v401_v30 = vand.u32 2147483647, %v1109_v21  ;;  %v522_v48 = vmul.f32 1.442695, %v512_v23  ;;  %673 = vmatpush.bf16.msra.mxu1 %v892_v3  ;;  %895 = vmatpush.bf16.msra.mxu3 %v892_v3 }
  0xaf   : > { %v478_v18 = vmul.f32 %v1066_v36, %v470_v10  ;;  %v447_v19 = vmul.f32 %v1091_v63, %v439_v11  ;;  %v458_v22 = vadd.f32 1.4214138, %v450_v13  ;;  %937 = vpow2.f32 %v520_v12  ;;  %v387_v44 = vpop.f32.mrf.mxu2 }
  0xb0   : > { %v1111_v27 = vpop.eup %929  ;;  %v420_v35 = vadd.f32 1.0, %v412_v24  ;;  %v409_v42 = vmul.f32 0.3275911, %v401_v30  ;;  %v508_v59 = vsub.f32 0.0, %v404_v16  ;;  %v1125_v60 = vadd.f32 %v1051_v14, %v387_v44 }
  0xb1   : > { %v486_v28 = vadd.f32 0.2548296, %v478_v18  ;;  %v455_v29 = vadd.f32 1.4214138, %v447_v19  ;;  %v466_v32 = vmul.f32 %v1086_v57, %v458_v22  ;;  %v435_v33 = vmul.f32 1.0614054, %v1111_v27 }
  0xb2   : > { %v1114_v31 = vpop.eup %931  ;;  %939 = vrcp.f32 %v420_v35  ;;  %v417_v55 = vadd.f32 1.0, %v409_v42  ;;  %v505_v7 = vsub.f32 0.0, %v401_v30  ;;  %v516_v15 = vmul.f32 %v508_v59, %v404_v16 }
  0xb3   : > { %v494_v37 = vmul.f32 %v1066_v36, %v486_v28  ;;  %v463_v38 = vmul.f32 %v1091_v63, %v455_v29  ;;  %v432_v40 = vmul.f32 1.0614054, %v1114_v31  ;;  %v934_v45 = vpop.eup %933  ;;  %v474_v46 = vadd.f32 -0.28449672, %v466_v32 }
  0xb4   : > { %v443_v47 = vadd.f32 -1.4531521, %v435_v33  ;;  %v936_v56 = vpop.eup %935  ;;  %941 = vrcp.f32 %v417_v55  ;;  %v1139_v18 = vmul.f32 0.70710677, %v1125_v60  ;;  %v513_v32 = vmul.f32 %v505_v7, %v401_v30 }
  0xb5   : > { %v534_v49 = vmul.f32 %v934_v45, %v494_v37  ;;  %v471_v51 = vadd.f32 -0.28449672, %v463_v38  ;;  %v440_v52 = vadd.f32 -1.4531521, %v432_v40  ;;  %v482_v58 = vmul.f32 %v1086_v57, %v474_v46  ;;  %v938_v62 = vpop.eup %937 }
  0xb6   : > { %v451_v36 = vmul.f32 %v1111_v27, %v443_v47  ;;  %943 = vpow2.f32 %v528_v34  ;;  %vm556_vm7 = vcmp.lt.f32.partialorder %v1100_v9, 0.0  ;;  %vm553_vm8 = vcmp.lt.f32.partialorder %v1109_v21, 0.0 }
  0xb7   : > { %v542_v0 = vsub.f32 1.0, %v534_v49  ;;  %v479_v1 = vmul.f32 %v1091_v63, %v471_v51  ;;  %v448_v2 = vmul.f32 %v1114_v31, %v440_v52  ;;  %v490_v4 = vadd.f32 0.2548296, %v482_v58 }
  0xb8   : > { %v459_v5 = vadd.f32 1.4214138, %v451_v36  ;;  %945 = vpow2.f32 %v522_v48  ;;  %v1133_v11 = vpop.eup %939  ;;  %v577_v9 = vmul.f32 0.5, %v1097_v6  ;;  %vm557_vm9 = vcmp.lt.f32.partialorder %v1139_v18, 0.0 }
  0xb9   : > { %v558_v8 = vsub.f32 0.0, %v542_v0  ;;  %v487_v14 = vadd.f32 0.2548296, %v479_v1  ;;  %v456_v10 = vadd.f32 1.4214138, %v448_v2  ;;  %v498_v12 = vmul.f32 %v1086_v57, %v490_v4  ;;  %v891_v57 = vld [vmem:[%s1243_s3] sm:$0xff] }
  0xba   : > { %v467_v13 = vmul.f32 %v1111_v27, %v459_v5  ;;  %v436_v24 = vmul.f32 1.0614054, %v1133_v11  ;;  %v1150_v33 = vpop.eup %941  ;;  %674 = vmatpush.bf16.msra.mxu1 %v891_v57  ;;  %896 = vmatpush.bf16.msra.mxu3 %v891_v57 }
  0xbb   : > { %v566_v19 = vsel %vm550_vm1, %v558_v8, %v542_v0  ;;  %v495_v22 = vmul.f32 %v1091_v63, %v487_v14  ;;  %v464_v23 = vmul.f32 %v1114_v31, %v456_v10  ;;  %v538_v29 = vmul.f32 %v936_v56, %v498_v12 }
  0xbc   : > { %v582_v28 = vadd.f32 1.0, %v566_v19  ;;  %v475_v16 = vadd.f32 -0.28449672, %v467_v13  ;;  %v444_v35 = vadd.f32 -1.4531521, %v436_v24  ;;  %v944_v37 = vpop.eup %943 }
  0xbd   : > { %v535_v17 = vmul.f32 %v938_v62, %v495_v22  ;;  %v472_v34 = vadd.f32 -0.28449672, %v464_v23  ;;  %v1153_v63 = vand.u32 2147483647, %v1139_v18  ;;  %v546_v40 = vsub.f32 1.0, %v538_v29 }
  0xbe   : > { %v590_v38 = vmul.f32 %v582_v28, %v1080_v50  ;;  %v483_v42 = vmul.f32 %v1111_v27, %v475_v16  ;;  %v433_v44 = vmul.f32 1.0614054, %v1150_v33  ;;  %v946_v45 = vpop.eup %945  ;;  %v452_v47 = vmul.f32 %v1133_v11, %v444_v35 }
  0xbf   : > { %v543_v30 = vsub.f32 1.0, %v535_v17  ;;  %v480_v46 = vmul.f32 %v1114_v31, %v472_v34  ;;  %v413_v50 = vmul.f32 0.3275911, %v1153_v63  ;;  %v562_v49 = vsub.f32 0.0, %v546_v40 }
  0xc0   : > { %v598_v48 = vpack.c.bf16 %v590_v38, %v590_v38  ;;  %v491_v51 = vadd.f32 0.2548296, %v483_v42  ;;  %v441_v52 = vadd.f32 -1.4531521, %v433_v44  ;;  %v460_v58 = vadd.f32 1.4214138, %v452_v47 }
  0xc1   : > { %v559_v55 = vsub.f32 0.0, %v543_v30  ;;  %v488_v56 = vadd.f32 0.2548296, %v480_v46  ;;  %v421_v36 = vadd.f32 1.0, %v413_v50  ;;  %v570_v59 = vsel %vm554_vm3, %v562_v49, %v546_v40 }
  0xc2   : > { %607 = vst.msk [vmem:[%s1163_s18] sm:$0xf] %vm606_vm2, %v598_v48  ;;  %v499_v62 = vmul.f32 %v1111_v27, %v491_v51  ;;  %v530_v0 = vmul.f32 1.442695, %v516_v15  ;;  %v449_v1 = vmul.f32 %v1150_v33, %v441_v52  ;;  %v586_v2 = vadd.f32 1.0, %v570_v59 }
  0xc3   : > { %v567_v3 = vsel %vm551_vm4, %v559_v55, %v543_v30  ;;  %v496_v4 = vmul.f32 %v1114_v31, %v488_v56  ;;  %v468_v5 = vmul.f32 %v1133_v11, %v460_v58  ;;  %947 = vrcp.f32 %v421_v36 }
  0xc4   : > { %v583_v7 = vadd.f32 1.0, %v567_v3  ;;  %v539_v8 = vmul.f32 %v944_v37, %v499_v62  ;;  %v457_v14 = vadd.f32 1.4214138, %v449_v1  ;;  %v594_v25 = vmul.f32 %v586_v2, %v1082_v53 }
  0xc5   : > { %v536_v10 = vmul.f32 %v946_v45, %v496_v4  ;;  %v476_v27 = vadd.f32 -0.28449672, %v468_v5  ;;  %v524_v12 = vmul.f32 1.442695, %v513_v32  ;;  %949 = vpow2.f32 %v530_v0 }
  0xc6   : > { %v591_v13 = vmul.f32 %v583_v7, %v1084_v54  ;;  %v547_v15 = vsub.f32 1.0, %v539_v8  ;;  %v465_v26 = vmul.f32 %v1150_v33, %v457_v14  ;;  %v602_v31 = vpack.c.bf16 %v594_v25, %v594_v25 }
  0xc7   : > { %v544_v19 = vsub.f32 1.0, %v536_v10  ;;  %v484_v22 = vmul.f32 %v1133_v11, %v476_v27  ;;  %951 = vpow2.f32 %v524_v12  ;;  %v509_v28 = vsub.f32 0.0, %v1153_v63 }
  0xc8   : > { %v599_v23 = vpack.c.bf16 %v591_v13, %v591_v13  ;;  %v563_v24 = vsub.f32 0.0, %v547_v15  ;;  %v473_v53 = vadd.f32 -0.28449672, %v465_v26  ;;  %611 = vst.msk [vmem:[%s1163_s18 + $0x10] sm:$0xf] %vm606_vm2, %v602_v31  ;;  %v631_v32 = vunpack.c.l.b16 %v598_v48 }
  0xc9   : > { %v560_v57 = vsub.f32 0.0, %v544_v19  ;;  %v492_v54 = vadd.f32 0.2548296, %v484_v22  ;;  %v948_v29 = vpop.eup %947  ;;  %v576_v40 = vmul.f32 0.5, %v1069_v39  ;;  %v517_v49 = vmul.f32 %v509_v28, %v1153_v63 }
  0xca   : > { %608 = vst.msk [vmem:[%s1163_s18 + $0x4] sm:$0xf] %vm606_vm2, %v599_v23  ;;  %v571_v16 = vsel %vm555_vm5, %v563_v24, %v547_v15  ;;  %v481_v41 = vmul.f32 %v1150_v33, %v473_v53  ;;  %v632_v17 = vunpack.c.l.b16 %v599_v23  ;;  %v437_v37 = vmul.f32 1.0614054, %v948_v29 }
  0xcb   : > { %v587_v34 = vadd.f32 1.0, %v571_v16  ;;  %v568_v35 = vsel %vm552_vm6, %v560_v57, %v544_v19  ;;  %v500_v43 = vmul.f32 %v1133_v11, %v492_v54  ;;  %v950_v38 = vpop.eup %949  ;;  %v635_v36 = vunpack.c.l.b16 %v602_v31 }
  0xcc   : > { %v584_v42 = vadd.f32 1.0, %v568_v35  ;;  %v489_v44 = vadd.f32 0.2548296, %v481_v41  ;;  %v639_v45 = vpack.c.b16 %v632_v17, %v631_v32  ;;  %v445_v47 = vadd.f32 -1.4531521, %v437_v37 }
  0xcd   : > { %v595_v30 = vmul.f32 %v587_v34, %v1106_v20  ;;  %v540_v46 = vmul.f32 %v950_v38, %v500_v43  ;;  %v952_v11 = vpop.eup %951  ;;  %v532_v63 = vmul.f32 1.442695, %v517_v49  ;;  %v580_v2 = vmul.f32 0.5, %v1089_v61  ;;  %v922_v41 = vld [vmem:[%s1244_s4] ss:$0 sm:$0xff] }
  0xce   : > { %v592_v50 = vmul.f32 %v584_v42, %v576_v40  ;;  %v497_v48 = vmul.f32 %v1150_v33, %v489_v44  ;;  %880 = vmatmul.msk.bf16.vlgmr.msra.gmra.mxu1 %vm348_vm0, %v639_v45  ;;  %v453_v39 = vmul.f32 %v948_v29, %v445_v47  ;;  %v581_v24 = vmul.f32 0.5, %v1125_v60 }
  0xcf   : > { %v603_v51 = vpack.c.bf16 %v595_v30, %v595_v30  ;;  %v548_v52 = vsub.f32 1.0, %v540_v46  ;;  %953 = vpow2.f32 %v532_v63 }
  0xd0   : > { %v600_v55 = vpack.c.bf16 %v592_v50, %v592_v50  ;;  %v537_v56 = vmul.f32 %v952_v11, %v497_v48  ;;  %v461_v20 = vadd.f32 1.4214138, %v453_v39 }
  0xd1   : > { %612 = vst.msk [vmem:[%s1163_s18 + $0x14] sm:$0xf] %vm606_vm2, %v603_v51  ;;  %v564_v58 = vsub.f32 0.0, %v548_v52  ;;  %v636_v59 = vunpack.c.l.b16 %v603_v51 }
  0xd2   : > { %609 = vst.msk [vmem:[%s1163_s18 + $0x8] sm:$0xf] %vm606_vm2, %v600_v55  ;;  %v545_v33 = vsub.f32 1.0, %v537_v56  ;;  %v469_v0 = vmul.f32 %v948_v29, %v461_v20  ;;  %v633_v26 = vunpack.c.l.b16 %v600_v55 }
  0xd3   : > { %v572_v62 = vsel %vm556_vm7, %v564_v58, %v548_v52  ;;  %v641_v1 = vpack.c.b16 %v636_v59, %v635_v36 }
  0xd4   : > { %v588_v3 = vadd.f32 1.0, %v572_v62  ;;  %v561_v4 = vsub.f32 0.0, %v545_v33  ;;  %v477_v5 = vadd.f32 -0.28449672, %v469_v0 }
  0xd5   : > { %882 = vmatmul.msk.bf16.vlgmr.msra.gmra.mxu3 %vm348_vm0, %v641_v1  ;;  %v954_v21 = vpop.eup %953 }
  0xd6   : > { %v596_v7 = vmul.f32 %v588_v3, %v580_v2  ;;  %v569_v8 = vsel %vm553_vm8, %v561_v4, %v545_v33  ;;  %v485_v25 = vmul.f32 %v948_v29, %v477_v5 }
  0xd7   : > { %v585_v14 = vadd.f32 1.0, %v569_v8 }
  0xd8   : > { %v604_v10 = vpack.c.bf16 %v596_v7, %v596_v7  ;;  %v493_v12 = vadd.f32 0.2548296, %v485_v25 }
  0xd9   : > { %v593_v27 = vmul.f32 %v585_v14, %v577_v9 }
  0xda   : > { %613 = vst.msk [vmem:[%s1163_s18 + $0x18] sm:$0xf] %vm606_vm2, %v604_v10  ;;  %v501_v13 = vmul.f32 %v948_v29, %v493_v12  ;;  %v637_v28 = vunpack.c.l.b16 %v604_v10 }
  0xdb   : > { %v601_v61 = vpack.c.bf16 %v593_v27, %v593_v27 }
  0xdc   : > { %v541_v15 = vmul.f32 %v954_v21, %v501_v13 }
  0xdd   : > { %610 = vst.msk [vmem:[%s1163_s18 + $0xc] sm:$0xf] %vm606_vm2, %v601_v61  ;;  %v634_v31 = vunpack.c.l.b16 %v601_v61 }
  0xde   : > { %v549_v19 = vsub.f32 1.0, %v541_v15 }
  0xdf   : > { %v640_v22 = vpack.c.b16 %v634_v31, %v633_v26 }
  0xe0   : > { %v565_v23 = vsub.f32 0.0, %v549_v19 }
  0xe1   : > { %881 = vmatmul.msk.bf16.gmra.mxu1 %vm348_vm0, %v640_v22 }
  0xe2   : > { %v573_v6 = vsel %vm557_vm9, %v565_v23, %v549_v19 }
  0xe3   : > { %v589_v53 = vadd.f32 1.0, %v573_v6 }
  0xe5   : > { %v597_v57 = vmul.f32 %v589_v53, %v581_v24 }
  0xe7   : > { %v605_v54 = vpack.c.bf16 %v597_v57, %v597_v57 }
  0xe9   : > { %614 = vst.msk [vmem:[%s1163_s18 + $0x1c] sm:$0xf] %vm606_vm2, %v605_v54  ;;  %v638_v29 = vunpack.c.l.b16 %v605_v54 }
  0xeb   : > { %v642_v16 = vpack.c.b16 %v638_v29, %v637_v28 }
  0xed   : > { %883 = vmatmul.msk.bf16.gmra.mxu3 %vm348_vm0, %v642_v16 }
 0x14b   : > { %v676_v32 = vpop.f32.mrf.mxu1 }
 0x14c   : > { %v677_v17 = vadd.f32 %v922_v41, %v676_v32 }
 0x14e   : > { %v696_v60 = vpack.c.bf16 %v677_v17, %v677_v17 }
 0x150   : > { %704 = vst.msk [vmem:[%s313_s27] sm:$0xf] %vm606_vm2, %v696_v60 }
 0x153   : > { %v678_v18 = vpop.f32.mrf.mxu1 }
 0x154   : > { %v679_v34 = vadd.f32 %v922_v41, %v678_v18 }
 0x156   : > { %v697_v35 = vpack.c.bf16 %v679_v34, %v679_v34 }
 0x158   : > { %705 = vst.msk [vmem:[%s313_s27 + $0x4] sm:$0xf] %vm606_vm2, %v697_v35  ;;  %v686_v43 = vpop.f32.mrf.mxu3 }
 0x159   : > { %v687_v37 = vadd.f32 %v922_v41, %v686_v43 }
 0x15b   : > { %v700_v38 = vpack.c.bf16 %v687_v37, %v687_v37 }
 0x15d   : > { %708 = vst.msk [vmem:[%s313_s27 + $0x10] sm:$0xf] %vm606_vm2, %v700_v38 }
 0x15e   : > { %v681_v40 = vpop.f32.mrf.mxu1 }
 0x15f   : > { %v682_v42 = vadd.f32 %v922_v41, %v681_v40 }
 0x160   : > { %v688_v44 = vpop.f32.mrf.mxu3 }
 0x161   : > { %v698_v45 = vpack.c.bf16 %v682_v42, %v682_v42  ;;  %v689_v30 = vadd.f32 %v922_v41, %v688_v44 }
 0x163   : > { %706 = vst.msk [vmem:[%s313_s27 + $0x8] sm:$0xf] %vm606_vm2, %v698_v45  ;;  %v701_v46 = vpack.c.bf16 %v689_v30, %v689_v30 }
 0x165   : > { %709 = vst.msk [vmem:[%s313_s27 + $0x14] sm:$0xf] %vm606_vm2, %v701_v46 }
 0x166   : > { %v683_v47 = vpop.f32.mrf.mxu1 }
 0x167   : > { %v684_v50 = vadd.f32 %v922_v41, %v683_v47 }
 0x169   : > { %v699_v48 = vpack.c.bf16 %v684_v50, %v684_v50 }
 0x16b   : > { %707 = vst.msk [vmem:[%s313_s27 + $0xc] sm:$0xf] %vm606_vm2, %v699_v48 }
 0x170   : > { %v691_v49 = vpop.f32.mrf.mxu3 }
 0x171   : > { %v692_v11 = vadd.f32 %v922_v41, %v691_v49 }
 0x173   : > { %v702_v51 = vpack.c.bf16 %v692_v11, %v692_v11 }
 0x175   : > { %710 = vst.msk [vmem:[%s313_s27 + $0x18] sm:$0xf] %vm606_vm2, %v702_v51 }
 0x178   : > { %v693_v52 = vpop.f32.mrf.mxu3 }
 0x179   : > { %v694_v39 = vadd.f32 %v922_v41, %v693_v52 }
 0x17b   : > { %v703_v55 = vpack.c.bf16 %v694_v39, %v694_v39 }
 0x17d   : > { %711 = vst.msk [vmem:[%s313_s27 + $0x1c] sm:$0xf] %vm606_vm2, %v703_v55 }
 0x17e PF: > { %s17_s23 = sadd.s32 1, %s977_s23   ;;  %s1247_s21 = smov %s973_s22 }
 0x17f   : > { %p14_p5 = scmp.ge.s32.totalorder %s17_s23, 4   ;;  %s1248_s22 = smov %s1250_s24 }
 0x181   :  { %16 = sbr.rel (!%p14_p5) target bundleno = 2 (0x2), region = 82 }

</bundles_post_ra>
